<compile_context>
chip_gen: v7x
topology: tpu7x:2x2x1
jax: 0.10.0
libtpu: 0.0.40
codegen_flags: <defaults>
</compile_context>

<pallas_src>
import functools

import jax
import jax.numpy as jnp
from jax import lax
from jax.experimental import pallas as pl
from jax.experimental.pallas import tpu as pltpu


def _self_attention_kernel(gamma_ref, xq_ref, xk_ref, wf_ref, wg_ref, wh_ref,
                           bf_ref, bg_ref, bh_ref, out_ref,
                           g_sc, m_sc, l_sc, acc_sc,
                           *, compute_dtype, approx_recip):
    k = pl.program_id(2)
    nk = pl.num_programs(2)

    @pl.when(k == 0)
    def _init():
        # "Query" projection g = Wg @ x_q + bg, computed once per (b, q-tile).
        xq = xq_ref[0].astype(compute_dtype)                         # (C, TQ)
        g = jnp.dot(wg_ref[...], xq,
                    preferred_element_type=jnp.float32) + bg_ref[...]
        g_sc[...] = g.astype(g_sc.dtype)                             # (C8, TQ)
        m_sc[...] = jnp.full_like(m_sc, -jnp.inf)
        l_sc[...] = jnp.zeros_like(l_sc)
        acc_sc[...] = jnp.zeros_like(acc_sc)

    # "Key"/"value" projections of the current key tile (f = Wf@xk, h = Wh@xk).
    xk = xk_ref[0].astype(compute_dtype)                             # (C, TK)
    f = jnp.dot(wf_ref[...], xk,
                preferred_element_type=jnp.float32) + bf_ref[...]    # (C8, TK)
    h = jnp.dot(wh_ref[...], xk,
                preferred_element_type=jnp.float32) + bh_ref[...]    # (C,  TK)

    # s[i, j] = sum_c f[c, i] * g[c, j]  -- key index i on rows (torch s_mtx).
    s = lax.dot_general(
        f.astype(compute_dtype), g_sc[...],
        dimension_numbers=(((0,), (0,)), ((), ())),
        preferred_element_type=jnp.float32)                          # (TK, TQ)

    # Online softmax over the key axis (== torch softmax(dim=-2)), all in f32.
    m_prev = m_sc[...]                                               # (1, TQ)
    m_new = jnp.maximum(m_prev, jnp.max(s, axis=0, keepdims=True))   # (1, TQ)
    alpha = jnp.exp(m_prev - m_new)                                  # (1, TQ)
    p = jnp.exp(s - m_new)                                           # (TK, TQ)
    l_sc[...] = alpha * l_sc[...] + jnp.sum(p, axis=0, keepdims=True)
    acc_sc[...] = alpha * acc_sc[...] + jnp.dot(
        h.astype(compute_dtype), p.astype(compute_dtype),
        preferred_element_type=jnp.float32)                          # (C, TQ)
    m_sc[...] = m_new

    @pl.when(k == nk - 1)
    def _finalize():
        inv_l = pl.reciprocal(l_sc[...], approx=approx_recip)        # (1, TQ)
        o = acc_sc[...] * inv_l                                      # (C, TQ)
        out_ref[0] = (xq_ref[0] + gamma_ref[0] * o).astype(out_ref.dtype)


def _pick_tile(n, tile):
    if tile is not None:
        return tile if n % tile == 0 else n
    for t in (256, 128):
        if n % t == 0:
            return t
    return n


def self_attention_pallas(x_nchw, params, *, use_bf16=True, tile=None):
    """x_nchw: (B, C, H, W) float32; params as produced by init_params."""
    gamma, wf, wg, wh, bf, bg, bh = params
    B, C, H, W = x_nchw.shape
    N = H * W
    if C % 8 != 0:
        raise ValueError("in_channels must be a multiple of 8")
    C8 = C // 8

    # Channels-first flat layout: a pure reshape of NCHW (no transposes).
    x_cn = x_nchw.reshape(B, C, N)

    # Spatial tile size (lane axis): prefer 256, then 128, else a single tile.
    tq = _pick_tile(N, tile)
    tk = tq
    num_q = N // tq
    num_k = N // tk

    compute_dtype = jnp.bfloat16 if use_bf16 else jnp.float32

    # Pre-cast weights to the MXU operand dtype (stays resident in VMEM via a
    # constant index map; on the bf16 path this halves the weight footprint
    # and removes per-step in-kernel casts).
    wf_c = wf.astype(compute_dtype)
    wg_c = wg.astype(compute_dtype)
    wh_c = wh.astype(compute_dtype)

    # Biases as (rows, 1) columns so they broadcast over the lane (N) axis;
    # kept in f32 and added to the f32 matmul results.
    bf_col = bf.reshape(C8, 1).astype(jnp.float32)
    bg_col = bg.reshape(C8, 1).astype(jnp.float32)
    bh_col = bh.reshape(C, 1).astype(jnp.float32)

    kernel = functools.partial(
        _self_attention_kernel,
        compute_dtype=compute_dtype,
        approx_recip=use_bf16,   # EUP approx reciprocal on the fast path only
    )

    out_cn = pl.pallas_call(
        kernel,
        out_shape=jax.ShapeDtypeStruct((B, C, N), x_cn.dtype),
        grid=(B, num_q, num_k),
        in_specs=[
            pl.BlockSpec(memory_space=pltpu.SMEM),                  # gamma (1,)
            pl.BlockSpec((1, C, tq), lambda b, j, k: (b, 0, j)),    # x, query tile
            pl.BlockSpec((1, C, tk), lambda b, j, k: (b, 0, k)),    # x, key tile
            pl.BlockSpec((C8, C), lambda b, j, k: (0, 0)),          # Wf (resident)
            pl.BlockSpec((C8, C), lambda b, j, k: (0, 0)),          # Wg (resident)
            pl.BlockSpec((C, C), lambda b, j, k: (0, 0)),           # Wh (resident)
            pl.BlockSpec((C8, 1), lambda b, j, k: (0, 0)),          # bf
            pl.BlockSpec((C8, 1), lambda b, j, k: (0, 0)),          # bg
            pl.BlockSpec((C, 1), lambda b, j, k: (0, 0)),           # bh
        ],
        out_specs=pl.BlockSpec((1, C, tq), lambda b, j, k: (b, 0, j)),
        scratch_shapes=[
            pltpu.VMEM((C8, tq), compute_dtype),   # cached query projection g
            pltpu.VMEM((1, tq), jnp.float32),      # running max  m
            pltpu.VMEM((1, tq), jnp.float32),      # running sum  l
            pltpu.VMEM((C, tq), jnp.float32),      # output accumulator
        ],
        compiler_params=pltpu.CompilerParams(
            dimension_semantics=("parallel", "parallel", "arbitrary"),
            vmem_limit_bytes=32 * 1024 * 1024,     # safe on v5e/v6e/v7x
        ),
    )(gamma, x_cn, x_cn, wf_c, wg_c, wh_c, bf_col, bg_col, bh_col)

    return out_cn.reshape(B, C, H, W)


def reference_self_attention(x, params):
    """Pure-JAX replica of the PyTorch forward (for verification)."""
    gamma, wf, wg, wh, bf, bg, bh = params
    B, C, H, W = x.shape
    N = H * W

    def conv1x1(xx, w, b):
        return jnp.einsum('bchw,oc->bohw', xx, w) + b[None, :, None, None]

    fx = conv1x1(x, wf, bf).reshape(B, -1, N).transpose(0, 2, 1)   # (B, N, C8)
    gx = conv1x1(x, wg, bg).reshape(B, -1, N)                      # (B, C8, N)
    hx = conv1x1(x, wh, bh).reshape(B, -1, N)                      # (B, C, N)
    s = jnp.einsum('bnk,bkm->bnm', fx, gx)                         # (B, N, N)
    attn = jax.nn.softmax(s, axis=-2)
    o = jnp.einsum('bcn,bnm->bcm', hx, attn).reshape(B, C, H, W)
    return x + gamma[0] * o


def init_params(key, in_channels):
    """Deterministic synthetic init matching nn.Conv2d(...) parameter shapes."""
    out_channels = in_channels // 8
    k = jax.random.split(key, 6)
    scale = 1.0 / jnp.sqrt(in_channels)
    wf = jax.random.normal(k[0], (out_channels, in_channels), jnp.float32) * scale
    wg = jax.random.normal(k[1], (out_channels, in_channels), jnp.float32) * scale
    wh = jax.random.normal(k[2], (in_channels, in_channels), jnp.float32) * scale
    bf = jax.random.normal(k[3], (out_channels,), jnp.float32) * scale
    bg = jax.random.normal(k[4], (out_channels,), jnp.float32) * scale
    bh = jax.random.normal(k[5], (in_channels,), jnp.float32) * scale
    # PyTorch inits gamma to 0; use a nonzero value so the attention path is exercised.
    gamma = jnp.array([0.5], dtype=jnp.float32)
    return gamma, wf, wg, wh, bf, bg, bh


if __name__ == "__main__":
    key = jax.random.PRNGKey(0)
    kx, kp = jax.random.split(key)

    # N = H*W = 256; C must be a multiple of 8 (C // 8 projection channels).
    B, C, H, W = 2, 32, 16, 16
    x = jax.random.normal(kx, (B, C, H, W), jnp.float32)
    params = init_params(kp, C)

    ref = jax.block_until_ready(reference_self_attention(x, params))

    # All-f32 path with forced 128 tiles (2x2 grid over the spatial axis):
    # validates the multi-tile / online-softmax logic at tight tolerance.
    out_f32 = jax.block_until_ready(
        self_attention_pallas(x, params, use_bf16=False, tile=128))
    assert out_f32.shape == (B, C, H, W)
    assert jnp.allclose(out_f32, ref, atol=1e-4, rtol=1e-4), "f32 path mismatch"

    # Fast path: auto tile (256 here), bf16 MXU operands with f32 accumulation.
    out_bf16 = jax.block_until_ready(
        self_attention_pallas(x, params, use_bf16=True))
    assert out_bf16.shape == (B, C, H, W)
    assert jnp.allclose(out_bf16, ref, atol=5e-2, rtol=5e-2), "bf16 path mismatch"

    print("KERNEL_OK")
</pallas_src>

<mosaic_0001>
module attributes {stable_mosaic.version = 11 : i64} {
  func.func @_self_attention_kernel(%arg0: i32, %arg1: i32, %arg2: i32, %arg3: memref<1xf32, #tpu.memory_space<smem>>, %arg4: memref<1x32x128xf32, #tpu.memory_space<vmem>>, %arg5: memref<1x32x128xf32, #tpu.memory_space<vmem>>, %arg6: memref<4x32xf32, #tpu.memory_space<vmem>>, %arg7: memref<4x32xf32, #tpu.memory_space<vmem>>, %arg8: memref<32x32xf32, #tpu.memory_space<vmem>>, %arg9: memref<4x1xf32, #tpu.memory_space<vmem>>, %arg10: memref<4x1xf32, #tpu.memory_space<vmem>>, %arg11: memref<32x1xf32, #tpu.memory_space<vmem>>, %arg12: memref<1x32x128xf32, #tpu.memory_space<vmem>>, %arg13: memref<4x128xf32, #tpu.memory_space<vmem>>, %arg14: memref<1x128xf32, #tpu.memory_space<vmem>>, %arg15: memref<1x128xf32, #tpu.memory_space<vmem>>, %arg16: memref<32x128xf32, #tpu.memory_space<vmem>>) attributes {dimension_semantics = [#tpu.dimension_semantics<parallel>, #tpu.dimension_semantics<parallel>, #tpu.dimension_semantics<arbitrary>], iteration_bounds = array<i64: 2, 2, 2>, scalar_prefetch = 0 : i64, scratch_operands = 4 : i64, tpu.core_type = #tpu.core_type<tc>, window_params = [{transform_indices = @transform_0, window_bounds = array<i64: 1>}, {transform_indices = @transform_1, window_bounds = array<i64: 1, 32, 128>}, {transform_indices = @transform_2, window_bounds = array<i64: 1, 32, 128>}, {pipeline_mode = #tpu.pipeline_mode<synchronous>, transform_indices = @transform_3, window_bounds = array<i64: 4, 32>}, {pipeline_mode = #tpu.pipeline_mode<synchronous>, transform_indices = @transform_4, window_bounds = array<i64: 4, 32>}, {pipeline_mode = #tpu.pipeline_mode<synchronous>, transform_indices = @transform_5, window_bounds = array<i64: 32, 32>}, {pipeline_mode = #tpu.pipeline_mode<synchronous>, transform_indices = @transform_6, window_bounds = array<i64: 4, 1>}, {pipeline_mode = #tpu.pipeline_mode<synchronous>, transform_indices = @transform_7, window_bounds = array<i64: 4, 1>}, {pipeline_mode = #tpu.pipeline_mode<synchronous>, transform_indices = @transform_8, window_bounds = array<i64: 32, 1>}, {transform_indices = @transform_9, window_bounds = array<i64: 1, 32, 128>}]} {
    %c0_i32 = arith.constant 0 : i32
    %0 = arith.cmpi eq, %arg2, %c0_i32 : i32
    %1 = arith.extui %0 : i1 to i32
    %c0_i32_0 = arith.constant 0 : i32
    %2 = arith.cmpi ne, %1, %c0_i32_0 : i32
    scf.if %2 {
      %c0_31 = arith.constant 0 : index
      %c0_32 = arith.constant 0 : index
      %c0_33 = arith.constant 0 : index
      %42 = vector.load %arg4[%c0_31, %c0_32, %c0_33] : memref<1x32x128xf32, #tpu.memory_space<vmem>>, vector<1x32x128xf32>
      %43 = vector.shape_cast %42 : vector<1x32x128xf32> to vector<32x128xf32>
      %c0_34 = arith.constant 0 : index
      %c0_35 = arith.constant 0 : index
      %44 = vector.load %arg7[%c0_34, %c0_35] : memref<4x32xf32, #tpu.memory_space<vmem>>, vector<4x32xf32>
      %cst_36 = arith.constant dense<0.000000e+00> : vector<4x128xf32>
      %45 = tpu.matmul %44, %43, %cst_36 {dimension_numbers = #tpu.dot_dimension_numbers<[1], [0], [0], [1], [0, 0, 1, 1], [], []>} : vector<4x32xf32>, vector<32x128xf32>, vector<4x128xf32> -> vector<4x128xf32>
      %c0_37 = arith.constant 0 : index
      %c0_38 = arith.constant 0 : index
      %46 = vector.load %arg10[%c0_37, %c0_38] : memref<4x1xf32, #tpu.memory_space<vmem>>, vector<4x1xf32>
      %47 = vector.broadcast %46 : vector<4x1xf32> to vector<4x128xf32>
      %48 = arith.addf %45, %47 : vector<4x128xf32>
      %c0_39 = arith.constant 0 : index
      %c0_40 = arith.constant 0 : index
      %49 = vector.load %arg13[%c0_39, %c0_40] : memref<4x128xf32, #tpu.memory_space<vmem>>, vector<4x128xf32>
      tpu.vector_store %arg13[%c0_39, %c0_40], %48 {strides = array<i32>} : memref<4x128xf32, #tpu.memory_space<vmem>>, vector<4x128xf32>,
      %cst_41 = arith.constant 0xFF800000 : f32
      %50 = vector.broadcast %cst_41 : f32 to vector<1x128xf32>
      %c0_42 = arith.constant 0 : index
      %c0_43 = arith.constant 0 : index
      %51 = vector.load %arg14[%c0_42, %c0_43] : memref<1x128xf32, #tpu.memory_space<vmem>>, vector<1x128xf32>
      tpu.vector_store %arg14[%c0_42, %c0_43], %50 {strides = array<i32>} : memref<1x128xf32, #tpu.memory_space<vmem>>, vector<1x128xf32>,
      %cst_44 = arith.constant 0.000000e+00 : f32
      %52 = vector.broadcast %cst_44 : f32 to vector<1x128xf32>
      %c0_45 = arith.constant 0 : index
      %c0_46 = arith.constant 0 : index
      %53 = vector.load %arg15[%c0_45, %c0_46] : memref<1x128xf32, #tpu.memory_space<vmem>>, vector<1x128xf32>
      tpu.vector_store %arg15[%c0_45, %c0_46], %52 {strides = array<i32>} : memref<1x128xf32, #tpu.memory_space<vmem>>, vector<1x128xf32>,
      %cst_47 = arith.constant 0.000000e+00 : f32
      %54 = vector.broadcast %cst_47 : f32 to vector<32x128xf32>
      %c0_48 = arith.constant 0 : index
      %c0_49 = arith.constant 0 : index
      %55 = vector.load %arg16[%c0_48, %c0_49] : memref<32x128xf32, #tpu.memory_space<vmem>>, vector<32x128xf32>
      tpu.vector_store %arg16[%c0_48, %c0_49], %54 {strides = array<i32>} : memref<32x128xf32, #tpu.memory_space<vmem>>, vector<32x128xf32>,
    } else {
    }
    %c0 = arith.constant 0 : index
    %c0_1 = arith.constant 0 : index
    %c0_2 = arith.constant 0 : index
    %3 = vector.load %arg5[%c0, %c0_1, %c0_2] : memref<1x32x128xf32, #tpu.memory_space<vmem>>, vector<1x32x128xf32>
    %4 = vector.shape_cast %3 : vector<1x32x128xf32> to vector<32x128xf32>
    %c0_3 = arith.constant 0 : index
    %c0_4 = arith.constant 0 : index
    %5 = vector.load %arg6[%c0_3, %c0_4] : memref<4x32xf32, #tpu.memory_space<vmem>>, vector<4x32xf32>
    %cst = arith.constant dense<0.000000e+00> : vector<4x128xf32>
    %6 = tpu.matmul %5, %4, %cst {dimension_numbers = #tpu.dot_dimension_numbers<[1], [0], [0], [1], [0, 0, 1, 1], [], []>} : vector<4x32xf32>, vector<32x128xf32>, vector<4x128xf32> -> vector<4x128xf32>
    %c0_5 = arith.constant 0 : index
    %c0_6 = arith.constant 0 : index
    %7 = vector.load %arg9[%c0_5, %c0_6] : memref<4x1xf32, #tpu.memory_space<vmem>>, vector<4x1xf32>
    %8 = vector.broadcast %7 : vector<4x1xf32> to vector<4x128xf32>
    %9 = arith.addf %6, %8 : vector<4x128xf32>
    %c0_7 = arith.constant 0 : index
    %c0_8 = arith.constant 0 : index
    %10 = vector.load %arg8[%c0_7, %c0_8] : memref<32x32xf32, #tpu.memory_space<vmem>>, vector<32x32xf32>
    %cst_9 = arith.constant dense<0.000000e+00> : vector<32x128xf32>
    %11 = tpu.matmul %10, %4, %cst_9 {dimension_numbers = #tpu.dot_dimension_numbers<[1], [0], [0], [1], [0, 0, 1, 1], [], []>} : vector<32x32xf32>, vector<32x128xf32>, vector<32x128xf32> -> vector<32x128xf32>
    %c0_10 = arith.constant 0 : index
    %c0_11 = arith.constant 0 : index
    %12 = vector.load %arg11[%c0_10, %c0_11] : memref<32x1xf32, #tpu.memory_space<vmem>>, vector<32x1xf32>
    %13 = vector.broadcast %12 : vector<32x1xf32> to vector<32x128xf32>
    %14 = arith.addf %11, %13 : vector<32x128xf32>
    %c0_12 = arith.constant 0 : index
    %c0_13 = arith.constant 0 : index
    %15 = vector.load %arg13[%c0_12, %c0_13] : memref<4x128xf32, #tpu.memory_space<vmem>>, vector<4x128xf32>
    %cst_14 = arith.constant dense<0.000000e+00> : vector<128x128xf32>
    %16 = tpu.matmul %9, %15, %cst_14 {dimension_numbers = #tpu.dot_dimension_numbers<[0], [0], [1], [1], [0, 1, 1, 1], [], []>} : vector<4x128xf32>, vector<4x128xf32>, vector<128x128xf32> -> vector<128x128xf32>
    %c0_15 = arith.constant 0 : index
    %c0_16 = arith.constant 0 : index
    %17 = vector.load %arg14[%c0_15, %c0_16] : memref<1x128xf32, #tpu.memory_space<vmem>>, vector<1x128xf32>
    %cst_17 = arith.constant dense<0xFF800000> : vector<128xf32>
    %18 = vector.multi_reduction <maximumf>, %16, %cst_17 [0] : vector<128x128xf32> to vector<128xf32>
    %19 = vector.shape_cast %18 : vector<128xf32> to vector<1x128xf32>
    %20 = arith.maximumf %17, %19 : vector<1x128xf32>
    %21 = arith.subf %17, %20 : vector<1x128xf32>
    %22 = math.exp %21 : vector<1x128xf32>
    %23 = vector.broadcast %20 : vector<1x128xf32> to vector<128x128xf32>
    %24 = arith.subf %16, %23 : vector<128x128xf32>
    %25 = math.exp %24 : vector<128x128xf32>
    %c0_18 = arith.constant 0 : index
    %c0_19 = arith.constant 0 : index
    %26 = vector.load %arg15[%c0_18, %c0_19] : memref<1x128xf32, #tpu.memory_space<vmem>>, vector<1x128xf32>
    %27 = arith.mulf %22, %26 : vector<1x128xf32>
    %cst_20 = arith.constant dense<0.000000e+00> : vector<128xf32>
    %28 = vector.multi_reduction <add>, %25, %cst_20 [0] : vector<128x128xf32> to vector<128xf32>
    %29 = vector.shape_cast %28 : vector<128xf32> to vector<1x128xf32>
    %30 = arith.addf %27, %29 : vector<1x128xf32>
    %c0_21 = arith.constant 0 : index
    %c0_22 = arith.constant 0 : index
    %31 = vector.load %arg15[%c0_21, %c0_22] : memref<1x128xf32, #tpu.memory_space<vmem>>, vector<1x128xf32>
    tpu.vector_store %arg15[%c0_21, %c0_22], %30 {strides = array<i32>} : memref<1x128xf32, #tpu.memory_space<vmem>>, vector<1x128xf32>,
    %c0_23 = arith.constant 0 : index
    %c0_24 = arith.constant 0 : index
    %32 = vector.load %arg16[%c0_23, %c0_24] : memref<32x128xf32, #tpu.memory_space<vmem>>, vector<32x128xf32>
    %33 = vector.broadcast %22 : vector<1x128xf32> to vector<32x128xf32>
    %34 = arith.mulf %33, %32 : vector<32x128xf32>
    %cst_25 = arith.constant dense<0.000000e+00> : vector<32x128xf32>
    %35 = tpu.matmul %14, %25, %cst_25 {dimension_numbers = #tpu.dot_dimension_numbers<[1], [0], [0], [1], [0, 0, 1, 1], [], []>} : vector<32x128xf32>, vector<128x128xf32>, vector<32x128xf32> -> vector<32x128xf32>
    %36 = arith.addf %34, %35 : vector<32x128xf32>
    %c0_26 = arith.constant 0 : index
    %c0_27 = arith.constant 0 : index
    %37 = vector.load %arg16[%c0_26, %c0_27] : memref<32x128xf32, #tpu.memory_space<vmem>>, vector<32x128xf32>
    tpu.vector_store %arg16[%c0_26, %c0_27], %36 {strides = array<i32>} : memref<32x128xf32, #tpu.memory_space<vmem>>, vector<32x128xf32>,
    %c0_28 = arith.constant 0 : index
    %c0_29 = arith.constant 0 : index
    %38 = vector.load %arg14[%c0_28, %c0_29] : memref<1x128xf32, #tpu.memory_space<vmem>>, vector<1x128xf32>
    tpu.vector_store %arg14[%c0_28, %c0_29], %20 {strides = array<i32>} : memref<1x128xf32, #tpu.memory_space<vmem>>, vector<1x128xf32>,
    %c1_i32 = arith.constant 1 : i32
    %39 = arith.cmpi eq, %arg2, %c1_i32 : i32
    %40 = arith.extui %39 : i1 to i32
    %c0_i32_30 = arith.constant 0 : i32
    %41 = arith.cmpi ne, %40, %c0_i32_30 : i32
    scf.if %41 {
      %c0_31 = arith.constant 0 : index
      %c0_32 = arith.constant 0 : index
      %42 = vector.load %arg15[%c0_31, %c0_32] : memref<1x128xf32, #tpu.memory_space<vmem>>, vector<1x128xf32>
      %43 = tpu.reciprocal %42 : vector<1x128xf32> -> vector<1x128xf32>
      %c0_33 = arith.constant 0 : index
      %c0_34 = arith.constant 0 : index
      %44 = vector.load %arg16[%c0_33, %c0_34] : memref<32x128xf32, #tpu.memory_space<vmem>>, vector<32x128xf32>
      %45 = vector.broadcast %43 : vector<1x128xf32> to vector<32x128xf32>
      %46 = arith.mulf %44, %45 : vector<32x128xf32>
      %c0_35 = arith.constant 0 : index
      %c0_36 = arith.constant 0 : index
      %c0_37 = arith.constant 0 : index
      %47 = vector.load %arg4[%c0_35, %c0_36, %c0_37] : memref<1x32x128xf32, #tpu.memory_space<vmem>>, vector<1x32x128xf32>
      %48 = vector.shape_cast %47 : vector<1x32x128xf32> to vector<32x128xf32>
      %c0_38 = arith.constant 0 : index
      %49 = memref.load %arg3[%c0_38] : memref<1xf32, #tpu.memory_space<smem>>
      %50 = vector.broadcast %49 : f32 to vector<32x128xf32>
      %51 = arith.mulf %50, %46 : vector<32x128xf32>
      %52 = arith.addf %48, %51 : vector<32x128xf32>
      %c0_39 = arith.constant 0 : index
      %c0_40 = arith.constant 0 : index
      %c0_41 = arith.constant 0 : index
      %53 = vector.load %arg12[%c0_39, %c0_40, %c0_41] : memref<1x32x128xf32, #tpu.memory_space<vmem>>, vector<1x32x128xf32>
      %54 = vector.shape_cast %53 : vector<1x32x128xf32> to vector<32x128xf32>
      %55 = vector.shape_cast %52 : vector<32x128xf32> to vector<1x32x128xf32>
      tpu.vector_store %arg12[%c0_39, %c0_40, %c0_41], %55 {strides = array<i32>} : memref<1x32x128xf32, #tpu.memory_space<vmem>>, vector<1x32x128xf32>,
    } else {
    }
    return
  }
  func.func @transform_0(%arg0: i32, %arg1: i32, %arg2: i32) -> i32 {
    %c0_i32 = arith.constant 0 : i32
    %c0_i32_0 = arith.constant 0 : i32
    return %c0_i32 : i32
  }
  func.func @transform_1(%arg0: i32, %arg1: i32, %arg2: i32) -> (i32, i32, i32) {
    %c0_i32 = arith.constant 0 : i32
    %c0_i32_0 = arith.constant 0 : i32
    return %arg0, %c0_i32, %arg1 : i32, i32, i32
  }
  func.func @transform_2(%arg0: i32, %arg1: i32, %arg2: i32) -> (i32, i32, i32) {
    %c0_i32 = arith.constant 0 : i32
    %c0_i32_0 = arith.constant 0 : i32
    return %arg0, %c0_i32, %arg2 : i32, i32, i32
  }
  func.func @transform_3(%arg0: i32, %arg1: i32, %arg2: i32) -> (i32, i32) {
    %c0_i32 = arith.constant 0 : i32
    %c0_i32_0 = arith.constant 0 : i32
    %c0_i32_1 = arith.constant 0 : i32
    return %c0_i32, %c0_i32_0 : i32, i32
  }
  func.func @transform_4(%arg0: i32, %arg1: i32, %arg2: i32) -> (i32, i32) {
    %c0_i32 = arith.constant 0 : i32
    %c0_i32_0 = arith.constant 0 : i32
    %c0_i32_1 = arith.constant 0 : i32
    return %c0_i32, %c0_i32_0 : i32, i32
  }
  func.func @transform_5(%arg0: i32, %arg1: i32, %arg2: i32) -> (i32, i32) {
    %c0_i32 = arith.constant 0 : i32
    %c0_i32_0 = arith.constant 0 : i32
    %c0_i32_1 = arith.constant 0 : i32
    return %c0_i32, %c0_i32_0 : i32, i32
  }
  func.func @transform_6(%arg0: i32, %arg1: i32, %arg2: i32) -> (i32, i32) {
    %c0_i32 = arith.constant 0 : i32
    %c0_i32_0 = arith.constant 0 : i32
    %c0_i32_1 = arith.constant 0 : i32
    return %c0_i32, %c0_i32_0 : i32, i32
  }
  func.func @transform_7(%arg0: i32, %arg1: i32, %arg2: i32) -> (i32, i32) {
    %c0_i32 = arith.constant 0 : i32
    %c0_i32_0 = arith.constant 0 : i32
    %c0_i32_1 = arith.constant 0 : i32
    return %c0_i32, %c0_i32_0 : i32, i32
  }
  func.func @transform_8(%arg0: i32, %arg1: i32, %arg2: i32) -> (i32, i32) {
    %c0_i32 = arith.constant 0 : i32
    %c0_i32_0 = arith.constant 0 : i32
    %c0_i32_1 = arith.constant 0 : i32
    return %c0_i32, %c0_i32_0 : i32, i32
  }
  func.func @transform_9(%arg0: i32, %arg1: i32, %arg2: i32) -> (i32, i32, i32) {
    %c0_i32 = arith.constant 0 : i32
    %c0_i32_0 = arith.constant 0 : i32
    return %arg0, %c0_i32, %arg1 : i32, i32, i32
  }
}

</mosaic_0001>

<bundles_post_ra>
// kernel: tpu_custom_call.1
= control target key start
LH: loop header
LB: loop body
LE: loop exit
PB: predicated region body
PF: predicated region fallthrough
CT: control target
= control target key end

     0   :  { %s2553_s0 = inlined_call_operand.<no memory space> [shape: f32[1], index: 0, kind: input, shape index: {}]   ;;  %s2554_s1 = inlined_call_operand.hbm [shape: f32[2,32,256], index: 1, kind: input, shape index: {}]   ;;  %s2555_s2 = inlined_call_operand.hbm [shape: f32[2,32,256], index: 2, kind: input, shape index: {}]   ;;  %s2556_s3 = inlined_call_operand.vmem [shape: f32[4,32], index: 3, kind: input, shape index: {}]   ;;  %s2557_s4 = inlined_call_operand.vmem [shape: f32[4,32], index: 4, kind: input, shape index: {}]   ;;  %s2558_s5 = inlined_call_operand.vmem [shape: f32[32,32], index: 5, kind: input, shape index: {}]   ;;  %s2559_s6 = inlined_call_operand.vmem [shape: f32[4,1], index: 6, kind: input, shape index: {}]   ;;  %s2560_s7 = inlined_call_operand.vmem [shape: f32[4,1], index: 7, kind: input, shape index: {}]   ;;  %s2561_s8 = inlined_call_operand.vmem [shape: f32[32,1], index: 8, kind: input, shape index: {}]   ;;  %s2562_s9 = inlined_call_operand.hbm [shape: f32[2,32,256], index: 9, kind: output, shape index: {}]  }
   0x1   :  { %2582 = sst [smem:[#allocation25_spill]] %s2554_s1 }
   0x2   :  { %2583 = sst [smem:[#allocation26_spill]] %s2558_s5 }
   0x3   :  { %2584 = sst [smem:[#allocation27_spill]] %s2561_s8 }
   0x4   :  { %2585 = sst [smem:[#allocation28_spill]] %s2562_s9 }
   0x5   :  { %14 = sst [smem:[#allocation6]] %s2553_s0 }
   0x6   :  { %15 = vsyncpa [#allocation8], 0 }
   0x7   :  { %17 = vsyncpa [#allocation8 + $0x1], 0 }
   0x8   :  { %18 = vsyncpa [#allocation11], 0 }
   0x9   :  { %20 = vsyncpa [#allocation11 + $0x1], 0 }
   0xa   :  { %21 = vsyncpa [#allocation9], 0 }
   0xb   :  { %23 = vsyncpa [#allocation9 + $0x1], 0  ;;  %s2044_s11 = smov 0   ;;  %s2046_s12 = smov 0  }
   0xc   :  { %s2048_s13 = smov 0   ;;  %s2050_s14 = smov 0  }
   0xd   :  { %s2052_s15 = smov 0   ;;  %s2054_s16 = smov 0  }
   0xe   :  { %s2056_s17 = smov 0   ;;  %s2058_s0 = smov 0  }
   0xf   :  { %s2060_s18 = smov 0   ;;  %s2062_s19 = smov 0  }
  0x10   :  { %s2064_s20 = smov 0   ;;  %s2066_s21 = smov 0  }
  0x11   :  { %s2068_s22 = smov 0  }
  0x12 LB: > { %2586 = sst [smem:[#allocation16_spill]] %s1935_s14  ;;  %s1341_s23 = sadd.s32 4294967295, %s1971_s22   ;;  %s1971_s22 = sphi %s2068_s22, %s29_s22   ;;  %s1967_s21 = sphi %s2066_s21, %s2643_s21   ;;  %s1963_s20 = sphi %s2064_s20, %s2642_s20   ;;  %s1959_s19 = sphi %s2062_s19, %s2631_s19   ;;  %s1955_s18 = sphi %s2060_s18, %s2641_s18   ;;  %s1951_s0 = sphi %s2058_s0, %s2630_s0   ;;  %s1947_s17 = sphi %s2056_s17, %s2629_s17   ;;  %s1943_s16 = sphi %s2054_s16, %s2640_s16   ;;  %s1939_s15 = sphi %s2052_s15, %s2639_s15   ;;  %s1935_s14 = sphi %s2050_s14, %s2638_s14   ;;  %s1931_s13 = sphi %s2048_s13, %s2637_s13   ;;  %s1927_s12 = sphi %s2046_s12, %s2636_s12   ;;  %s1923_s11 = sphi %s2044_s11, %s2635_s11  }
  0x13   : > { %2587 = sst [smem:[#allocation17_spill]] %s1951_s0  ;;  %s1342_s24 = sadd.s32 4294967294, %s1971_s22  }
  0x14   : > { %2588 = sst [smem:[#allocation18_spill]] %s1955_s18  ;;  %p85_p0 = scmp.ne.s32.totalorder %s1943_s16, %s1939_s15 }
  0x15   : > { %2589 = sst [smem:[#allocation19_spill]] %s1959_s19  ;;  %p2569_p1 = scmp.eq.s32.totalorder %s1971_s22, 0 }
  0x16   : > { %2590 = sst [smem:[#allocation20_spill]] %s1963_s20  ;;  %p91_p2 = scmp.ne.s32.totalorder %s1939_s15, %s1935_s14 }
  0x17   : > { %p2118_p3 = scmp.eq.s32.totalorder %s1341_s23, 0  ;;  %p271_p4 = scmp.eq.s32.totalorder %s1341_s23, 7 }
  0x18   : > { %p2124_p5 = por %p2569_p1, %p85_p0  ;;  %p277_p6 = scmp.eq.s32.totalorder %s1342_s24, 7 }
  0x19   : > { %p2130_p7 = por %p2118_p3, %p91_p2  ;;  %p2134_p8 = por %p271_p4, %p85_p0 }
  0x1a   : > { %p2138_p9 = por %p277_p6, %p91_p2  ;;  %p2568_p10 = scmp.lt.s32.totalorder %s1971_s22, 8 }
  0x1b   : > { %s2593_s29 = scalar_select %p2130_p7, 1, 0 }
  0x1c   : > { %s2594_s30 = scalar_select %p2134_p8, 1, 0 }
  0x1d   : > { %s2596_s10 = scalar_select %p2138_p9, 1, 0 }
  0x1e   : > { %2595 = sst [smem:[#allocation21_spill]] %s2594_s30  ;;  %s318_s23 = sand.u32 1, %s1943_s16  }
  0x1f   : > { %2597 = sst [smem:[#allocation22_spill]] %s2596_s10  ;;  %s1345_s26 = sshll.u32 %s318_s23, 5 }
  0x20   : > { %s1346_s25 = sshll.u32 %s1967_s21, 3  ;;  %s322_s24 = scalar_lea.vmem [#allocation7], %s1345_s26 }
  0x21   : > { %s327_s14 = sadd.s32 %s1963_s20, %s1346_s25  ;;  %s330_s9 = sshll.u32 %s322_s24, 4  ;;  %s2148_s9 = int_to_ptr.vmem [resolvable:$true] %s330_s9 }
  0x22   : > { %s1347_s0 = sshll.u32 %s327_s14, 7  ;;  %s2598_s1 = sld [smem:[#allocation25_spill]] }
  0x23   : > { %p2159_p11 = pnand %p2568_p10, %p2124_p5  ;;  %s2163_s14 = scalar_lea.sflag [#allocation8], %s318_s23 }
  0x25   : > { %p1771_p13 = pneg %p2159_p11 }
  0x28   : > { %s2153_s5 = scalar_lea.hbm %s2598_s1, %s1347_s0  ;;  %s1774_s18 = scalar_lea.hbm %s2598_s1, 2048 }
  0x29   : > { %s1769_s26 = scalar_lea.hbm %s2153_s5, 512  ;;  %p1775_p4 = scmp.lt.u32.totalorder %s2153_s5, %s2598_s1 }
  0x2a   : > { %p1770_p12 = scmp.ne.s32.totalorder %s2153_s5, %s1769_s26  ;;  %p1776_p5 = scmp.lt.u32.totalorder %s1774_s18, %s1769_s26 }
  0x2b   : > { %p1778_p10 = scmp.lt.u32.totalorder %s1769_s26, %s2153_s5 }
  0x2c   : > { %p1772_p0 = pnand %p1771_p13, %p1770_p12  ;;  %p1777_p6 = por %p1776_p5, %p1775_p4 }
  0x2e   : > { %p1773_p2 = pneg %p1772_p0  ;;  %p1779_p1 = por %p1778_p10, %p1777_p6 }
  0x30   : > { %p1780_p9 = pnand %p1779_p1, %p1773_p2 }
  0x32   : > { %1783 = shalt.err (!%p1780_p9)
}
  0x33   : > { %s1784_s23 = scalar_lea.vmem %s2148_s9, 512  ;;  %s1973_s8 = smov [#allocation7]  }
  0x34   : > { %p1785_p12 = scmp.ne.s32.totalorder %s2148_s9, %s1784_s23  ;;  %s1789_s0 = sshll.u32 %s1973_s8, 4  ;;  %s1790_s0 = int_to_ptr.vmem [resolvable:$false] %s1789_s0 }
  0x35   : > { %s1791_s28 = scalar_lea.vmem %s1790_s0, 1024  ;;  %p1792_p7 = scmp.lt.s32.totalorder %s2148_s9, %s1790_s0 }
  0x36   : > { %p1787_p0 = pnand %p1785_p12, %p1771_p13  ;;  %p1793_p4 = scmp.lt.s32.totalorder %s1791_s28, %s1784_s23 }
  0x38   : > { %p1788_p8 = pneg %p1787_p0  ;;  %p1794_p5 = por %p1793_p4, %p1792_p7 }
  0x3a   : > { %p1795_p10 = pnand %p1794_p5, %p1788_p8 }
  0x3c   : > { %1798 = shalt.err (!%p1795_p10)
}
  0x3d   : > { %s2572_s26 = smov 256   ;;  %s2573_s18 = smov 128  }
  0x3e   : > { %s2574_s24 = smov 8   ;;  %p1351_p1 = scmp.ge.s32.totalorder %s1971_s22, 1 }
  0x3f   : > { %1601 = dma.hbm_to_vmem [thread:$0]  (!%p2159_p11), %s2153_s5, 512, %s2148_s9, %s2163_s14, %s2572_s26, %s2573_s18, %s2574_s24  }
  0x40   : > { %p360_p7 = scmp.lt.s32.totalorder %s1971_s22, 9  ;;  %s41_s0 = sadd.s32 1, %s1959_s19 }
  0x41   : > { %p42_p9 = scmp.ge.s32.totalorder %s41_s0, 2  ;;  %p119_p13 = scmp.ne.s32.totalorder %s1927_s12, %s1923_s11 }
  0x42   : > { %p2197_p8 = pnand %p1351_p1, %p360_p7  ;;  %s2602_s5 = sadd.s32 1, %s1963_s20 }
  0x43   : > { %s2645_s0 = smov (%p42_p9, %s41_s0), 0  ;;  %s2647_s5 = smov (!%p42_p9, %s2602_s5), %s1963_s20 }
  0x44   : > { %2601 = sst [smem:[#allocation23_spill]] %s2645_s0  ;;  %s102_s9 = ssub.s32 %s1959_s19, %s2645_s0 }
  0x45   : > { %p113_p11 = scmp.ne.s32.totalorder %s1931_s13, %s1927_s12  ;;  %p46_p2 = scmp.ge.s32.totalorder %s2647_s5, 2 }
  0x46   : > { %p2216_p6 = por %p119_p13, %p2118_p3  ;;  %s340_s28 = sand.u32 1, %s1931_s13  }
  0x47   : > { %s349_s26 = sadd.s32 %s1959_s19, %s1346_s25  ;;  %s2649_s5 = smov (%p46_p2, %s2647_s5), 0 }
  0x48   : > { %s2603_s14 = scalar_select %p2216_p6, 1, 0 }
  0x49   : > { %2604 = sst [smem:[#allocation24_spill]] %s2649_s5  ;;  %s2605_s11 = sadd.s32 1, %s1967_s21 }
  0x4a   : > { %s2651_s11 = smov (!%p46_p2, %s2605_s11), %s1967_s21  ;;  %s74_s18 = ssub.s32 %s1963_s20, %s2649_s5 }
  0x4b   : > { %p2606_p12 = scmp.eq.s32.totalorder %s1971_s22, 0  ;;  %p50_p3 = scmp.ge.s32.totalorder %s2651_s11, 2 }
  0x4c   : > { %s1348_s27 = sshll.u32 %s340_s28, 5  ;;  %s1350_s25 = sshll.u32 %s349_s26, 7 }
  0x4d   : > { %p2233_p0 = por %p113_p11, %p2606_p12  ;;  %s2653_s11 = smov (%p50_p3, %s2651_s11), 0 }
  0x4e   : > { %s2242_s1 = scalar_lea.hbm %s2555_s2, %s1350_s25  ;;  %s73_s5 = ssub.s32 %s1967_s21, %s2653_s11 }
  0x4f   : > { %s344_s0 = scalar_lea.vmem [#allocation10], %s1348_s27  ;;  %s75_s19 = sor.u32 %s74_s18, %s73_s5 }
  0x50   : > { %s352_s20 = sshll.u32 %s344_s0, 4  ;;  %s103_s30 = sor.u32 %s102_s9, %s73_s5  ;;  %s2246_s20 = int_to_ptr.vmem [resolvable:$true] %s352_s20 }
  0x51   : > { %p76_p4 = scmp.eq.s32.totalorder %s75_s19, 0  ;;  %p104_p5 = scmp.eq.s32.totalorder %s103_s30, 0 }
  0x52   : > { %p2608_p10 = scmp.lt.s32.totalorder %s1971_s22, 8  ;;  %s2610_s23 = sadd.s32 1, %s1943_s16 }
  0x53   : > { %s2259_s10 = scalar_select %p76_p4, %s1943_s16, %s2610_s23  }
  0x54   : > { %p2252_p1 = pnand %p2608_p10, %p2233_p0  ;;  %s2611_s0 = sadd.s32 1, %s1931_s13 }
  0x55   : > { %s2264_s27 = scalar_select %p104_p5, %s1931_s13, %s2611_s0  }
  0x56   : > { %s2266_s18 = scalar_lea.sflag [#allocation11], %s340_s28  ;;  %s1799_s19 = scalar_lea.hbm %s2242_s1, 512 }
  0x57   : > { %p1800_p7 = scmp.ne.s32.totalorder %s2242_s1, %s1799_s19  ;;  %p1801_p9 = pneg %p2252_p1 }
  0x58   : > { %s1804_s5 = scalar_lea.hbm %s2555_s2, 2048  ;;  %p1805_p2 = scmp.lt.u32.totalorder %s2242_s1, %s2555_s2 }
  0x59   : > { %p1802_p13 = pnand %p1801_p9, %p1800_p7  ;;  %p1806_p12 = scmp.lt.u32.totalorder %s1804_s5, %s1799_s19 }
  0x5a   : > { %p1808_p3 = scmp.lt.u32.totalorder %s1799_s19, %s2242_s1 }
  0x5b   : > { %p1803_p11 = pneg %p1802_p13  ;;  %p1807_p0 = por %p1806_p12, %p1805_p2 }
  0x5d   : > { %p1809_p4 = por %p1808_p3, %p1807_p0 }
  0x5f   : > { %p1810_p5 = pnand %p1809_p4, %p1803_p11 }
  0x61   : > { %1813 = shalt.err (!%p1810_p5)
}
  0x62   : > { %s1814_s28 = scalar_lea.vmem %s2246_s20, 512  ;;  %s1977_s23 = smov [#allocation10]  }
  0x63   : > { %p1815_p10 = scmp.ne.s32.totalorder %s2246_s20, %s1814_s28  ;;  %s1819_s0 = sshll.u32 %s1977_s23, 4  ;;  %s1820_s0 = int_to_ptr.vmem [resolvable:$false] %s1819_s0 }
  0x64   : > { %s1821_s30 = scalar_lea.vmem %s1820_s0, 1024  ;;  %p1822_p6 = scmp.lt.s32.totalorder %s2246_s20, %s1820_s0 }
  0x65   : > { %p1817_p7 = pnand %p1815_p10, %p1801_p9  ;;  %p1823_p2 = scmp.lt.s32.totalorder %s1821_s30, %s1814_s28 }
  0x67   : > { %p1818_p13 = pneg %p1817_p7  ;;  %p1824_p12 = por %p1823_p2, %p1822_p6 }
  0x69   : > { %p1825_p0 = pnand %p1824_p12, %p1818_p13 }
  0x6b   : > { %1828 = shalt.err (!%p1825_p0)
}
  0x6c   : > { %s2612_s19 = smov 8   ;;  %s2613_s24 = smov 128  }
  0x6d   : > { %s2614_s5 = smov 256   ;;  %364 = sbr.rel (%p2197_p8) target bundleno = 1313 (0x521), region = 56 }
  0x6e   : > { %1604 = dma.hbm_to_vmem [thread:$0]  (!%p2252_p1), %s2242_s1, 512, %s2246_s20, %s2266_s18, %s2614_s5, %s2613_s24, %s2612_s19  }
  0x6f   : > { %s2300_s9 = sand.u32 (!%p2197_p8), 1, %s1939_s15   ;;  %p2615_p6 = scmp.ne.s32.totalorder (!%p2197_p8), %s2593_s29, 0 }
  0x70   : > { %s1352_s25 = sshll.u32 (!%p2197_p8), %s2300_s9, 5  ;;  %s367_s28 = scalar_lea.sflag (!%p2197_p8), [#allocation8], %s2300_s9 }
  0x71   : > { %s2304_s23 = scalar_lea.vmem (!%p2197_p8), [#allocation7], %s1352_s25 }
  0x74   : > { %1910 = dma.done.wait (%p2615_p6), %s367_s28, 512  }
  0x75   : > { %1912 = vsyncadd (%p2615_p6), %s367_s28, 4294966784  ;;  %s375_s1 = sand.u32 1, %s1927_s12   ;;  %p2616_p8 = scmp.ne.s32.totalorder %s2603_s14, 0 }
  0x76   : > { %s1353_s20 = sshll.u32 %s375_s1, 5  ;;  %s376_s8 = scalar_lea.sflag [#allocation11], %s375_s1 }
  0x77   : > { %s2311_s26 = scalar_lea.vmem [#allocation10], %s1353_s20 }
  0x78   : > { %1914 = dma.done.wait (%p2616_p8), %s376_s8, 512  }
  0x79   : > { %1916 = vsyncadd (%p2616_p8), %s376_s8, 4294966784  ;;  %s2317_s18 = scalar_lea.vmem [#allocation12], %s1352_s25  ;;  %p1355_p1 = scmp.ne.s32.totalorder %s1947_s17, 0 }
  0x7a   : > { %v423_v0 = vld [vmem:[%s2304_s23] sm:$0xff] (!%p1355_p1)  ;;  %v424_v1 = vld [vmem:[%s2304_s23 + $0x8] sm:$0xff] (!%p1355_p1)  ;;  %v425_v2 = vld [vmem:[%s2304_s23 + $0x10] sm:$0xff] (!%p1355_p1)  ;;  %v1978_v3 = vmov (!%p1355_p1), 0.0|0.0   ;;  %vm1979_vm0 = vmmov (!%p1355_p1), 0   ;;  %v1980_v6 = vmov (!%p1355_p1), 0.0  }
  0x7b   : > { %422 = sbr.rel (%p1355_p1) target bundleno = 347 (0x15b), region = 68  ;;  %1540 = vmatprep.subr.bf16.mxu0 (!%p1355_p1), %v1978_v3  ;;  %v1541_v4 = vpack.c.bf16 (!%p1355_p1), %v424_v1, %v423_v0  ;;  %v426_v5 = vld [vmem:[%s2304_s23 + $0x18] sm:$0xff] (!%p1355_p1)  ;;  %1448 = vmatprep.mubr.msk.f32.mxu0 (!%p1355_p1), %vm1979_vm0, %v1980_v6  ;;  %510 = vst [vmem:[#allocation4] sm:$0x1] (!%p1355_p1), %v1980_v6  ;;  %511 = vst [vmem:[#allocation5] sm:$0xff] (!%p1355_p1), %v1980_v6  ;;  %v1981_v7 = vmov (!%p1355_p1), 0  }
  0x7c   : > { %512 = vst [vmem:[#allocation5 + $0x8] sm:$0xff] (!%p1355_p1), %v1980_v6  ;;  %513 = vst [vmem:[#allocation5 + $0x10] sm:$0xff] (!%p1355_p1), %v1980_v6  ;;  %1730 = vset.pattern.permute.xlu0 (!%p1355_p1), %v1981_v7  ;;  %v428_v8 = vld [vmem:[%s2560_s7] sm:$0xf] (!%p1355_p1)  ;;  %v1544_v9 = vpack.c.bf16 (!%p1355_p1), %v426_v5, %v425_v2  ;;  %vm434_vm1 = vcmask (!%p1355_p1), 261120   ;;  %v1982_v11 = vmov (!%p1355_p1), -inf  }
  0x7d   : > { %514 = vst [vmem:[#allocation5 + $0x18] sm:$0xff] (!%p1355_p1), %v1980_v6  ;;  %1542 = vmatpush3.bf16.msra.mxu0 (!%p1355_p1), %v1541_v4  ;;  %431 = vperm.xlu0 (!%p1355_p1), %1730, %v428_v8   ;;  %v427_v10 = vld [vmem:[%s2557_s4] sm:$0xf] (!%p1355_p1)  ;;  %509 = vst [vmem:[#allocation3] sm:$0x1] (!%p1355_p1), %v1982_v11 }
  0x7e   : > { %1543 = vmatprep.subr.bf16.mxu0 (!%p1355_p1), %v1978_v3 }
  0x81   : > { %1545 = vmatpush3.bf16.msra.mxu0 (!%p1355_p1), %v1544_v9 }
  0x84   : > { %1449 = vmatmul.mubr.msk.f32.vlgmr.msra.gmra.mrb[0].mxu0 %vm434_vm1, %v427_v10 }
  0xfc   : > { %v432_v12 = vpop.permute.xlu0 %431 }
 0x157   : > { %v504_v13 = vpop.f32.mrb[0].mxu0 }
 0x158   : > { %v505_v14 = vadd.f32 %v504_v13, %v432_v12  ;;  %v1450_v15 = vpop.f32.mrb[1].mxu0 }
 0x15a   : > { %508 = vst [vmem:[#allocation2] sm:$0xf] %v505_v14 }
 0x15b PF: > { %v515_v16 = vld [vmem:[%s2311_s26] sm:$0xff]  ;;  %v516_v17 = vld [vmem:[%s2311_s26 + $0x8] sm:$0xff]  ;;  %v517_v18 = vld [vmem:[%s2311_s26 + $0x10] sm:$0xff]  ;;  %v1983_v19 = vmov 0.0|0.0   ;;  %vm1984_vm2 = vmmov 0   ;;  %v1985_v22 = vmov 0.0  }
 0x15c   : > { %1546 = vmatprep.subr.bf16.mxu0 %v1983_v19  ;;  %v1547_v20 = vpack.c.bf16 %v516_v17, %v515_v16  ;;  %v518_v21 = vld [vmem:[%s2311_s26 + $0x18] sm:$0xff]  ;;  %1459 = vmatprep.mubr.msk.f32.mxu0 %vm1984_vm2, %v1985_v22  ;;  %v1986_v23 = vmov 0   ;;  %vm526_vm3 = vcmask 261120   ;;  %vm807_vm4 = vcmask 1043456   ;;  %s2617_s20 = sld [smem:[#allocation26_spill]]  ;;  %s2619_s24 = sld [smem:[#allocation27_spill]] }
 0x15d   : > { %1731 = vset.pattern.permute.xlu0 %v1986_v23  ;;  %v520_v24 = vld [vmem:[%s2559_s6] sm:$0xf]  ;;  %1732 = vset.pattern.permute.xlu1 %v1986_v23  ;;  %v1550_v25 = vpack.c.bf16 %v518_v21, %v517_v18  ;;  %vm758_vm5 = vcmask 31744   ;;  %p1379_p9 = scmp.ne.s32.totalorder %s1947_s17, 1 }
 0x15e   : > { %1548 = vmatpush3.bf16.msra.mxu0 %v1547_v20  ;;  %523 = vperm.xlu0 %1731, %v520_v24   ;;  %v519_v26 = vld [vmem:[%s2556_s3] sm:$0xf]  ;;  %s1193_s0 = sld [smem:[#allocation6]] (!%p1379_p9) }
 0x15f   : > { %1549 = vmatprep.subr.bf16.mxu0 %v1983_v19  ;;  %1553 = vmatprep.subr.bf16.mxu1 %v1547_v20 }
 0x160   : > { %1555 = vmatpush3.bf16.msra.mxu1 %v1547_v20 }
 0x161   : > { %1557 = vmatprep.subr.bf16.mxu1 %v1550_v25  ;;  %v725_v31 = vld [vmem:[#allocation2] sm:$0xf] }
 0x162   : > { %1551 = vmatpush3.bf16.msra.mxu0 %v1550_v25  ;;  %s2618_s8 = smov %s2617_s20  ;;  %v600_v32 = vld [vmem:[%s2617_s20] sm:$0xff]  ;;  %v605_v37 = vld [vmem:[%s2619_s24 + $0x8] sm:$0xff]  ;;  %v606_v38 = vld [vmem:[%s2619_s24 + $0x10] sm:$0xff] }
 0x163   : > { %1476 = vmatprep.subr.msk.mxu0 %vm807_vm4, %v725_v31  ;;  %v601_v33 = vld [vmem:[%s2618_s8 + $0x8] sm:$0xff]  ;;  %v602_v34 = vld [vmem:[%s2618_s8 + $0x10] sm:$0xff]  ;;  %1470 = vmatprep.mubr.msk.f32.mxu1 %vm526_vm3, %v600_v32  ;;  %v604_v35 = vld [vmem:[%s2619_s24] sm:$0xff] }
 0x164   : > { %1559 = vmatpush3.bf16.msra.mxu1 %v1550_v25  ;;  %610 = vperm.xlu1 %1732, %v604_v35   ;;  %v603_v36 = vld [vmem:[%s2618_s8 + $0x18] sm:$0xff] }
 0x165   : > { %1460 = vmatmul.mubr.msk.f32.vlgmr.msra.gmra.mrb[0].mxu0 %vm526_vm3, %v519_v26  ;;  %v607_v39 = vld [vmem:[%s2619_s24 + $0x18] sm:$0xff] }
 0x166   : > { %1477 = vmatpush3.msk.msra.mxu0 %vm807_vm4, %v725_v31  ;;  %v983_v31 = vlaneseq }
 0x167   : > { %1471 = vmatmul.mubr.msk.f32.vlgmr.msra.gmra.mrb[0].mxu1 %vm526_vm3, %v601_v33 }
 0x168   : > { %1473 = vmatprep.mubr.msk.f32.mxu1 %vm526_vm3, %v602_v34  ;;  %615 = vperm.xlu1 %1732, %v605_v37   ;;  %v984_v34 = vshrl.u32 %v983_v31, 7 }
 0x16b   : > { %1474 = vmatmul.mubr.msk.f32.gmra.mrb[2].mxu1 %vm526_vm3, %v603_v36  ;;  %v956_v36 = vld [vmem:[#allocation3] sm:$0x1] }
 0x16c   : > { %620 = vperm.xlu1 %1732, %v606_v38   ;;  %v2430_v38 = vsub.s32 0, %v984_v34 }
 0x170   : > { %625 = vperm.xlu1 %1732, %v607_v39  }
 0x1dd   : > { %v524_v27 = vpop.permute.xlu0 %523 }
 0x1e3   : > { %v611_v61 = vpop.permute.xlu1 %610 }
 0x238   : > { %v596_v28 = vpop.f32.mrb[0].mxu0 }
 0x239   : > { %v597_v29 = vadd.f32 %v596_v28, %v524_v27  ;;  %v1461_v30 = vpop.f32.mrb[1].mxu0 }
 0x23a   : > { %v2389_v58 = vpop.f32.mrb[0].mxu1 }
 0x23b   : > { %726 = vxpose.xlu0.b32.start.end [1/1] (short) %v597_v29, 128  ;;  %v706_v59 = vpop.f32.mrb[1].mxu1 }
 0x23c   : > { %v707_v0 = vadd.f32 %v706_v59, %v611_v61 }
 0x23e   : > { %v2391_v60 = vpop.f32.mrb[2].mxu1  ;;  %1534 = vmatprep.mubr.f32.mxu1 %v707_v0 }
 0x23f   : > { %v2393_v62 = vpop.f32.mrb[3].mxu1 }
 0x2bb   : > { %v742_v40 = vpop.trf.xlu0 }
 0x2bc   : > { %1478 = vmatprep.mubr.msk.f32.mxu0 %vm758_vm5, %v742_v40 }
 0x2bf   : > { %v743_v41 = vpop.trf.xlu0 }
 0x2c0   : > { %1479 = vmatmul.mubr.msk.f32.vlgmr.msra.gmra.mrb[2].mxu0 %vm758_vm5, %v743_v41 }
 0x2c3   : > { %v744_v42 = vpop.trf.xlu0 }
 0x2c4   : > { %1481 = vmatprep.mubr.msk.f32.mxu0 %vm758_vm5, %v744_v42 }
 0x2c7   : > { %v745_v43 = vpop.trf.xlu0 }
 0x2c8   : > { %1482 = vmatmul.mubr.msk.f32.gmra.mrb[4].mxu0 %vm758_vm5, %v745_v43 }
 0x2cb   : > { %v746_v44 = vpop.trf.xlu0 }
 0x2cc   : > { %1484 = vmatprep.mubr.msk.f32.mxu0 %vm758_vm5, %v746_v44 }
 0x2cf   : > { %v747_v45 = vpop.trf.xlu0 }
 0x2d0   : > { %1485 = vmatmul.mubr.msk.f32.gmra.mrb[6].mxu0 %vm758_vm5, %v747_v45 }
 0x2d3   : > { %v748_v46 = vpop.trf.xlu0 }
 0x2d4   : > { %1487 = vmatprep.mubr.msk.f32.mxu0 %vm758_vm5, %v748_v46 }
 0x2d7   : > { %v749_v47 = vpop.trf.xlu0 }
 0x2d8   : > { %1488 = vmatmul.mubr.msk.f32.gmra.mrb[8].mxu0 %vm758_vm5, %v749_v47 }
 0x2db   : > { %v750_v48 = vpop.trf.xlu0 }
 0x2dc   : > { %1490 = vmatprep.mubr.msk.f32.mxu0 %vm758_vm5, %v750_v48 }
 0x2df   : > { %v751_v49 = vpop.trf.xlu0 }
 0x2e0   : > { %1491 = vmatmul.mubr.msk.f32.gmra.mrb[10].mxu0 %vm758_vm5, %v751_v49 }
 0x2e3   : > { %v752_v50 = vpop.trf.xlu0 }
 0x2e4   : > { %1493 = vmatprep.mubr.msk.f32.mxu0 %vm758_vm5, %v752_v50 }
 0x2e7   : > { %v753_v51 = vpop.trf.xlu0 }
 0x2e8   : > { %1494 = vmatmul.mubr.msk.f32.gmra.mrb[12].mxu0 %vm758_vm5, %v753_v51 }
 0x2eb   : > { %v754_v52 = vpop.trf.xlu0 }
 0x2ec   : > { %1496 = vmatprep.mubr.msk.f32.mxu0 %vm758_vm5, %v754_v52 }
 0x2ef   : > { %v755_v53 = vpop.trf.xlu0 }
 0x2f0   : > { %1497 = vmatmul.mubr.msk.f32.gmra.mrb[14].mxu0 %vm758_vm5, %v755_v53 }
 0x2f3   : > { %v756_v54 = vpop.trf.xlu0 }
 0x2f4   : > { %1499 = vmatprep.mubr.msk.f32.mxu0 %vm758_vm5, %v756_v54 }
 0x2f7   : > { %v757_v55 = vpop.trf.xlu0 }
 0x2f8   : > { %1500 = vmatmul.mubr.msk.f32.gmra.mrb[16].mxu0 %vm758_vm5, %v757_v55 }
 0x393   : > { %v2385_v56 = vpop.f32.mrb[2].mxu0 }
 0x394   : > { %v2387_v57 = vpop.f32.mrb[3].mxu0 }
 0x39b   : > { %v2395_v63 = vpop.f32.mrb[4].mxu0 }
 0x39c   : > { %v2397_v1 = vpop.f32.mrb[5].mxu0 }
 0x3a3   : > { %v2399_v2 = vpop.f32.mrb[6].mxu0 }
 0x3a4   : > { %v958_v3 = vmax.f32 %v2385_v56, %v2399_v2  ;;  %v897_v4 = vpop.f32.mrb[7].mxu0 }
 0x3a5   : > { %v957_v5 = vmax.f32 %v2387_v57, %v897_v4 }
 0x3ab   : > { %v2404_v6 = vpop.f32.mrb[8].mxu0 }
 0x3ac   : > { %v960_v7 = vmax.f32 %v2395_v63, %v2404_v6  ;;  %v907_v8 = vpop.f32.mrb[9].mxu0 }
 0x3ad   : > { %v959_v9 = vmax.f32 %v2397_v1, %v907_v8 }
 0x3b3   : > { %v2409_v10 = vpop.f32.mrb[10].mxu0 }
 0x3b4   : > { %v962_v11 = vmax.f32 %v958_v3, %v2409_v10  ;;  %v917_v12 = vpop.f32.mrb[11].mxu0 }
 0x3b5   : > { %v961_v13 = vmax.f32 %v957_v5, %v917_v12 }
 0x3bb   : > { %v2412_v14 = vpop.f32.mrb[12].mxu0 }
 0x3bc   : > { %v964_v15 = vmax.f32 %v960_v7, %v2412_v14  ;;  %v2415_v16 = vpop.f32.mrb[13].mxu0 }
 0x3bd   : > { %v963_v17 = vmax.f32 %v959_v9, %v2415_v16 }
 0x3c3   : > { %v2418_v18 = vpop.f32.mrb[14].mxu0 }
 0x3c4   : > { %v966_v19 = vmax.f32 %v962_v11, %v2418_v18  ;;  %v2421_v20 = vpop.f32.mrb[15].mxu0 }
 0x3c5   : > { %v965_v21 = vmax.f32 %v961_v13, %v2421_v20 }
 0x3c7   : > { %v969_v22 = vmax.f32 %v965_v21, %v966_v19 }
 0x3cb   : > { %v2424_v23 = vpop.f32.mrb[16].mxu0 }
 0x3cc   : > { %v968_v24 = vmax.f32 %v964_v15, %v2424_v23  ;;  %v2427_v25 = vpop.f32.mrb[17].mxu0 }
 0x3cd   : > { %v967_v26 = vmax.f32 %v963_v17, %v2427_v25 }
 0x3cf   : > { %v970_v27 = vmax.f32 %v967_v26, %v968_v24 }
 0x3d1   : > { %v971_v28 = vmax.f32 %v969_v22, %v970_v27 }
 0x3d3   : > { %v972_v29 = vrot.slane %v971_v28, 4 }
 0x3d5   : > { %v973_v30 = vmax.f32 %v971_v28, %v972_v29 }
 0x3d7   : > { %v974_v32 = vrot.slane %v973_v30, 2 }
 0x3d9   : > { %v975_v33 = vmax.f32 %v973_v30, %v974_v32 }
 0x3db   : > { %v976_v35 = vrot.slane %v975_v33, 1 }
 0x3dd   : > { %v977_v37 = vmax.f32 %v975_v33, %v976_v35 }
 0x3df   : > { %v978_v39 = vmax.f32 %v956_v36, %v977_v37 }
 0x3e1   : > { %v979_v40 = vsub.f32 %v956_v36, %v978_v39  ;;  %v986_v41 = vrot.slane %v978_v39, %v2430_v38  ;;  %1168 = vst [vmem:[#allocation3] sm:$0x1] %v978_v39 }
 0x3e3   : > { %v980_v42 = vmul.f32 1.442695, %v979_v40  ;;  %v988_v43 = vsub.f32 %v2387_v57, %v986_v41  ;;  %v989_v44 = vsub.f32 %v2385_v56, %v986_v41  ;;  %v990_v45 = vsub.f32 %v2397_v1, %v986_v41 }
 0x3e4   : > { %v991_v46 = vsub.f32 %v2395_v63, %v986_v41  ;;  %v992_v47 = vsub.f32 %v897_v4, %v986_v41  ;;  %v993_v48 = vsub.f32 %v2399_v2, %v986_v41  ;;  %v994_v49 = vsub.f32 %v907_v8, %v986_v41 }
 0x3e5   : > { %1733 = vpow2.f32 %v980_v42  ;;  %v995_v50 = vsub.f32 %v2404_v6, %v986_v41  ;;  %v996_v51 = vsub.f32 %v917_v12, %v986_v41  ;;  %v997_v52 = vsub.f32 %v2409_v10, %v986_v41 }
 0x3e6   : > { %v998_v53 = vsub.f32 %v2415_v16, %v986_v41  ;;  %v999_v54 = vsub.f32 %v2412_v14, %v986_v41  ;;  %v1000_v55 = vsub.f32 %v2421_v20, %v986_v41  ;;  %v1001_v56 = vsub.f32 %v2418_v18, %v986_v41 }
 0x3e7   : > { %v1002_v57 = vsub.f32 %v2427_v25, %v986_v41  ;;  %v1003_v59 = vsub.f32 %v2424_v23, %v986_v41  ;;  %v1004_v61 = vmul.f32 1.442695, %v988_v43  ;;  %v1006_v63 = vmul.f32 1.442695, %v989_v44 }
 0x3e8   : > { %v1008_v0 = vmul.f32 1.442695, %v990_v45  ;;  %v1010_v1 = vmul.f32 1.442695, %v991_v46  ;;  %v1012_v2 = vmul.f32 1.442695, %v992_v47 }
 0x3e9   : > { %1735 = vpow2.f32 %v1004_v61  ;;  %v1014_v3 = vmul.f32 1.442695, %v993_v48  ;;  %v1016_v4 = vmul.f32 1.442695, %v994_v49  ;;  %v1018_v5 = vmul.f32 1.442695, %v995_v50 }
 0x3ea   : > { %1737 = vpow2.f32 %v1006_v63  ;;  %v1020_v6 = vmul.f32 1.442695, %v996_v51  ;;  %v1022_v7 = vmul.f32 1.442695, %v997_v52  ;;  %v1024_v9 = vmul.f32 1.442695, %v998_v53  ;;  %v616_v52 = vpop.permute.xlu1 %615 }
 0x3eb   : > { %1739 = vpow2.f32 %v1008_v0  ;;  %v1026_v10 = vmul.f32 1.442695, %v999_v54  ;;  %v1028_v12 = vmul.f32 1.442695, %v1000_v55  ;;  %v1030_v13 = vmul.f32 1.442695, %v1001_v56 }
 0x3ec   : > { %1741 = vpow2.f32 %v1010_v1  ;;  %v1032_v15 = vmul.f32 1.442695, %v1002_v57  ;;  %v1034_v17 = vmul.f32 1.442695, %v1003_v59  ;;  %v712_v63 = vadd.f32 %v2389_v58, %v616_v52 }
 0x3ed   : > { %1743 = vpow2.f32 %v1012_v2 }
 0x3ee   : > { %1745 = vpow2.f32 %v1014_v3  ;;  %v621_v56 = vpop.permute.xlu1 %620 }
 0x3ef   : > { %v2446_v8 = vpop.eup %1733  ;;  %1747 = vpow2.f32 %v1016_v4  ;;  %v717_v1 = vadd.f32 %v2393_v62, %v621_v56 }
 0x3f0   : > { %1749 = vpow2.f32 %v1018_v5  ;;  %v2450_v11 = vrot.slane %v2446_v8, %v2430_v38  ;;  %v1036_v5 = vld [vmem:[#allocation4] sm:$0x1] }
 0x3f1   : > { %1751 = vpow2.f32 %v1020_v6 }
 0x3f2   : > { %1753 = vpow2.f32 %v1022_v7  ;;  %v626_v0 = vpop.permute.xlu1 %625  ;;  %v1037_v7 = vmul.f32 %v2446_v8, %v1036_v5 }
 0x3f3   : > { %v1736_v14 = vpop.eup %1735  ;;  %1755 = vpow2.f32 %v1024_v9  ;;  %v722_v4 = vadd.f32 %v2391_v60, %v626_v0 }
 0x3f4   : > { %v1738_v16 = vpop.eup %1737  ;;  %1757 = vpow2.f32 %v1026_v10 }
 0x3f5   : > { %v1740_v18 = vpop.eup %1739  ;;  %1759 = vpow2.f32 %v1028_v12  ;;  %v1038_v19 = vadd.f32 %v1738_v16, %v1736_v14  ;;  %v1560_v20 = vpack.c.bf16 %v1738_v16, %v1736_v14  ;;  %v1062_v12 = vld [vmem:[#allocation5 + $0x8] sm:$0xff] }
 0x3f6   : > { %v1742_v21 = vpop.eup %1741  ;;  %1761 = vpow2.f32 %v1030_v13  ;;  %v1061_v13 = vld [vmem:[#allocation5] sm:$0xff]  ;;  %v1072_v58 = vmul.f32 %v2450_v11, %v1062_v12 }
 0x3f7   : > { %v1744_v22 = vpop.eup %1743  ;;  %1763 = vpow2.f32 %v1032_v15  ;;  %v1039_v23 = vadd.f32 %v1740_v18, %v1038_v19  ;;  %1561 = vmatprep.subr.bf16.mxu1 %v1560_v20  ;;  %v1564_v24 = vpack.c.bf16 %v1742_v21, %v1740_v18  ;;  %v1071_v62 = vmul.f32 %v2450_v11, %v1061_v13  ;;  %v1064_v15 = vld [vmem:[#allocation5 + $0x18] sm:$0xff]  ;;  %v1063_v18 = vld [vmem:[#allocation5 + $0x10] sm:$0xff] }
 0x3f8   : > { %v1746_v25 = vpop.eup %1745  ;;  %1765 = vpow2.f32 %v1034_v17  ;;  %1563 = vmatpush3.bf16.msra.mxu1 %v1560_v20  ;;  %v1074_v19 = vmul.f32 %v2450_v11, %v1064_v15  ;;  %v1073_v20 = vmul.f32 %v2450_v11, %v1063_v18 }
 0x3f9   : > { %v1748_v26 = vpop.eup %1747  ;;  %v1040_v27 = vadd.f32 %v1742_v21, %v1039_v23  ;;  %1565 = vmatprep.subr.bf16.mxu1 %v1564_v24  ;;  %v1568_v28 = vpack.c.bf16 %v1746_v25, %v1744_v22 }
 0x3fa   : > { %v1750_v29 = vpop.eup %1749 }
 0x3fb   : > { %v1752_v30 = vpop.eup %1751  ;;  %v1041_v31 = vadd.f32 %v1744_v22, %v1040_v27  ;;  %v1572_v32 = vpack.c.bf16 %v1750_v29, %v1748_v26 }
 0x3fc   : > { %v1754_v33 = vpop.eup %1753  ;;  %1567 = vmatpush3.bf16.msra.mxu1 %v1564_v24 }
 0x3fd   : > { %v1756_v34 = vpop.eup %1755  ;;  %v1042_v35 = vadd.f32 %v1746_v25, %v1041_v31  ;;  %1569 = vmatprep.subr.bf16.mxu1 %v1568_v28  ;;  %v1576_v36 = vpack.c.bf16 %v1754_v33, %v1752_v30 }
 0x3fe   : > { %v1758_v37 = vpop.eup %1757 }
 0x3ff   : > { %v1760_v39 = vpop.eup %1759  ;;  %v1043_v40 = vadd.f32 %v1748_v26, %v1042_v35  ;;  %v1580_v41 = vpack.c.bf16 %v1758_v37, %v1756_v34 }
 0x400   : > { %v1762_v42 = vpop.eup %1761  ;;  %1571 = vmatpush3.bf16.msra.mxu1 %v1568_v28 }
 0x401   : > { %v1764_v43 = vpop.eup %1763  ;;  %v1044_v44 = vadd.f32 %v1750_v29, %v1043_v40  ;;  %1573 = vmatprep.subr.bf16.mxu1 %v1572_v32  ;;  %v1584_v45 = vpack.c.bf16 %v1762_v42, %v1760_v39 }
 0x402   : > { %v1766_v46 = vpop.eup %1765 }
 0x403   : > { %v1045_v47 = vadd.f32 %v1752_v30, %v1044_v44  ;;  %v1588_v48 = vpack.c.bf16 %v1766_v46, %v1764_v43  ;;  %v1194_v30 = vstv (!%p1379_p9), %s1193_s0 }
 0x404   : > { %1575 = vmatpush3.bf16.msra.mxu1 %v1572_v32  ;;  %v1189_v32 = vld [vmem:[%s2304_s23] sm:$0xff] (!%p1379_p9) }
 0x405   : > { %v1046_v49 = vadd.f32 %v1754_v33, %v1045_v47  ;;  %1577 = vmatprep.subr.bf16.mxu1 %v1576_v36 }
 0x407   : > { %v1047_v50 = vadd.f32 %v1756_v34, %v1046_v49 }
 0x408   : > { %1579 = vmatpush3.bf16.msra.mxu1 %v1576_v36  ;;  %v1190_v36 = vld [vmem:[%s2304_s23 + $0x8] sm:$0xff] (!%p1379_p9) }
 0x409   : > { %v1048_v51 = vadd.f32 %v1758_v37, %v1047_v50  ;;  %1581 = vmatprep.subr.bf16.mxu1 %v1580_v41  ;;  %v1191_v37 = vld [vmem:[%s2304_s23 + $0x10] sm:$0xff] (!%p1379_p9) }
 0x40b   : > { %v1049_v53 = vadd.f32 %v1760_v39, %v1048_v51  ;;  %v1192_v39 = vld [vmem:[%s2304_s23 + $0x18] sm:$0xff] (!%p1379_p9) }
 0x40c   : > { %1583 = vmatpush3.bf16.msra.mxu1 %v1580_v41 }
 0x40d   : > { %v1050_v54 = vadd.f32 %v1762_v42, %v1049_v53  ;;  %1585 = vmatprep.subr.bf16.mxu1 %v1584_v45 }
 0x40f   : > { %v1051_v55 = vadd.f32 %v1764_v43, %v1050_v54 }
 0x410   : > { %1587 = vmatpush3.bf16.msra.mxu1 %v1584_v45 }
 0x411   : > { %v1052_v57 = vadd.f32 %v1766_v46, %v1051_v55  ;;  %1589 = vmatprep.subr.bf16.mxu1 %v1588_v48 }
 0x413   : > { %v1053_v59 = vrot.slane %v1052_v57, 4 }
 0x414   : > { %1591 = vmatpush3.bf16.msra.mxu1 %v1588_v48 }
 0x415   : > { %v1054_v61 = vadd.f32 %v1053_v59, %v1052_v57 }
 0x417   : > { %v1055_v2 = vrot.slane %v1054_v61, 2  ;;  %1535 = vmatmul.mubr.f32.vlgmr.msra.gmra.mrb[4].mxu1 %v712_v63 }
 0x418   : > { %1537 = vmatprep.mubr.f32.mxu1 %v717_v1 }
 0x419   : > { %v1056_v3 = vadd.f32 %v1055_v2, %v1054_v61 }
 0x41b   : > { %v1057_v6 = vrot.slane %v1056_v3, 1  ;;  %1538 = vmatmul.mubr.f32.gmra.mrb[6].mxu1 %v722_v4 }
 0x41d   : > { %v1058_v9 = vadd.f32 %v1057_v6, %v1056_v3 }
 0x41f   : > { %v1059_v10 = vadd.f32 %v1058_v9, %v1037_v7 }
 0x421   : > { %1060 = vst [vmem:[#allocation4] sm:$0x1] %v1059_v10 }
 0x428   : > { %v1173_v24 = vld [vmem:[#allocation4] sm:$0x1] (!%p1379_p9) }
 0x429   : > { %1767 = vrcp.f32 (!%p1379_p9), %v1173_v24 }
 0x433   : > { %v1768_v26 = vpop.eup (!%p1379_p9), %1767 }
 0x434   : > { %v1183_v29 = vrot.slane (!%p1379_p9), %v1768_v26, %v2430_v38 }
 0x4ea   : > { %v1536_v14 = vpop.f32.mrb[4].mxu1 }
 0x4eb   : > { %v1161_v16 = vadd.f32 %v1536_v14, %v1072_v58  ;;  %v1141_v17 = vpop.f32.mrb[5].mxu1 }
 0x4ec   : > { %v1160_v60 = vadd.f32 %v1141_v17, %v1071_v62  ;;  %1172 = sbr.rel (%p1379_p9) target bundleno = 1281 (0x501), region = 72 }
 0x4ed   : > { %1165 = vst [vmem:[#allocation5 + $0x8] sm:$0xff] %v1161_v16 }
 0x4ee   : > { %1164 = vst [vmem:[#allocation5] sm:$0xff] %v1160_v60  ;;  %v1539_v8 = vpop.f32.mrb[6].mxu1 }
 0x4ef   : > { %v1163_v21 = vadd.f32 %v1539_v8, %v1074_v19  ;;  %v1151_v22 = vpop.f32.mrb[7].mxu1 }
 0x4f0   : > { %v1162_v23 = vadd.f32 %v1151_v22, %v1073_v20 }
 0x4f1   : > { %1167 = vst [vmem:[#allocation5 + $0x18] sm:$0xff] %v1163_v21 }
 0x4f2   : > { %1166 = vst [vmem:[#allocation5 + $0x10] sm:$0xff] %v1162_v23 }
 0x4f4   : > { %v1176_v27 = vld [vmem:[#allocation5 + $0x8] sm:$0xff] }
 0x4f5   : > { %v1175_v25 = vld [vmem:[#allocation5] sm:$0xff]  ;;  %v1186_v33 = vmul.f32 %v1183_v29, %v1176_v27 }
 0x4f6   : > { %v1185_v31 = vmul.f32 %v1183_v29, %v1175_v25 }
 0x4f7   : > { %v1196_v41 = vmul.f32 %v1194_v30, %v1186_v33 }
 0x4f8   : > { %v1178_v11 = vld [vmem:[#allocation5 + $0x18] sm:$0xff]  ;;  %v1195_v40 = vmul.f32 %v1194_v30, %v1185_v31 }
 0x4f9   : > { %v1177_v28 = vld [vmem:[#allocation5 + $0x10] sm:$0xff]  ;;  %v1188_v35 = vmul.f32 %v1183_v29, %v1178_v11  ;;  %v1200_v45 = vadd.f32 %v1196_v41, %v1190_v36 }
 0x4fa   : > { %v1187_v34 = vmul.f32 %v1183_v29, %v1177_v28  ;;  %v1199_v44 = vadd.f32 %v1195_v40, %v1189_v32 }
 0x4fb   : > { %v1198_v43 = vmul.f32 %v1194_v30, %v1188_v35  ;;  %1204 = vst [vmem:[%s2317_s18 + $0x8] sm:$0xff] %v1200_v45 }
 0x4fc   : > { %v1197_v42 = vmul.f32 %v1194_v30, %v1187_v34  ;;  %1203 = vst [vmem:[%s2317_s18] sm:$0xff] %v1199_v44 }
 0x4fd   : > { %v1202_v46 = vadd.f32 %v1198_v43, %v1192_v39 }
 0x4fe   : > { %v1201_v38 = vadd.f32 %v1197_v42, %v1191_v37 }
 0x4ff   : > { %1206 = vst [vmem:[%s2317_s18 + $0x18] sm:$0xff] %v1202_v46 }
 0x500   : > { %1205 = vst [vmem:[%s2317_s18 + $0x10] sm:$0xff] %v1201_v38 }
 0x501 PF: > { %s2620_s17 = sld [smem:[#allocation18_spill]]  ;;  %s2621_s30 = sld [smem:[#allocation17_spill]] }
 0x502   : > { %s2622_s19 = sld [smem:[#allocation21_spill]]  ;;  %s1222_s25 = sshll.u32 %s2317_s18, 4  ;;  %s2473_s25 = int_to_ptr.vmem [resolvable:$true] %s1222_s25 }
 0x503   : > { %s2623_s26 = sld [smem:[#allocation28_spill]]  ;;  %s1208_s14 = scalar_lea.sflag [#allocation9], %s2300_s9 }
 0x504   : > { %s1829_s0 = scalar_lea.vmem %s2473_s25, 512 }
 0x505   : > { %p1830_p11 = scmp.ne.s32.totalorder %s2473_s25, %s1829_s0 }
 0x507   : > { %s1381_s5 = sshll.u32 %s2620_s17, 3  ;;  %s1987_s17 = smov [#allocation12]  }
 0x508   : > { %s1219_s23 = sadd.s32 %s2621_s30, %s1381_s5  ;;  %p2624_p3 = scmp.ne.s32.totalorder %s2622_s19, 0 }
 0x509   : > { %s1382_s28 = sshll.u32 %s1219_s23, 7  ;;  %s1833_s30 = sshll.u32 %s1987_s17, 4  ;;  %s1834_s30 = int_to_ptr.vmem [resolvable:$false] %s1833_s30 }
 0x50a   : > { %s2478_s29 = scalar_lea.hbm %s2623_s26, %s1382_s28  ;;  %p1831_p4 = pnand %p1830_p11, %p2624_p3 }
 0x50b   : > { %s1835_s18 = scalar_lea.vmem %s1834_s30, 1024  ;;  %p1836_p10 = scmp.lt.s32.totalorder %s2473_s25, %s1834_s30 }
 0x50c   : > { %p1832_p5 = pneg %p1831_p4  ;;  %p1837_p7 = scmp.lt.s32.totalorder %s1835_s18, %s1829_s0 }
 0x50e   : > { %p1838_p13 = por %p1837_p7, %p1836_p10 }
 0x510   : > { %p1839_p2 = pnand %p1838_p13, %p1832_p5 }
 0x512   : > { %1842 = shalt.err (!%p1839_p2)
}
 0x513   : > { %s1843_s5 = scalar_lea.hbm %s2478_s29, 512  ;;  %s1847_s1 = scalar_lea.hbm %s2623_s26, 2048 }
 0x514   : > { %p1844_p12 = scmp.ne.s32.totalorder %s2478_s29, %s1843_s5  ;;  %p1848_p8 = scmp.lt.u32.totalorder %s2478_s29, %s2623_s26 }
 0x515   : > { %p1849_p1 = scmp.lt.u32.totalorder %s1847_s1, %s1843_s5  ;;  %p1851_p11 = scmp.lt.u32.totalorder %s1843_s5, %s2478_s29 }
 0x516   : > { %p1845_p0 = pnand %p1844_p12, %p2624_p3 }
 0x517   : > { %p1850_p9 = por %p1849_p1, %p1848_p8 }
 0x518   : > { %p1846_p6 = pneg %p1845_p0 }
 0x519   : > { %p1852_p4 = por %p1851_p11, %p1850_p9 }
 0x51b   : > { %p1853_p5 = pnand %p1852_p4, %p1846_p6 }
 0x51d   : > { %1856 = shalt.err (!%p1853_p5)
}
 0x51e   : > { %s1988_s0 = smov 128   ;;  %s1989_s30 = smov 256  }
 0x51f   : > { %s1990_s18 = smov 8  }
 0x520   : > { %1596 = dma.vmem_to_hbm [thread:$0]  (%p2624_p3), %s2473_s25, 512, %s2478_s29, %s1208_s14, %s1988_s0, %s1989_s30, %s1990_s18  }
 0x521 PF: > { %s2625_s23 = sld [smem:[#allocation16_spill]]  ;;  %s2626_s28 = sld [smem:[#allocation22_spill]] }
 0x522   : > { %p1610_p10 = scmp.ge.s32.totalorder %s1971_s22, 2 }
 0x527   : > { %s1237_s1 = sand.u32 1, %s2625_s23   ;;  %p2627_p7 = scmp.ne.s32.totalorder %s2626_s28, 0 }
 0x528   : > { %s1238_s5 = scalar_lea.sflag [#allocation9], %s1237_s1 }
 0x529   : > { %p1606_p13 = pnand %p1610_p10, %p2627_p7 }
 0x52b   : > { %1918 = dma.done.wait (!%p1606_p13), %s1238_s5, 512  }
 0x52c   : > { %1920 = vsyncadd (!%p1606_p13), %s1238_s5, 4294966784  ;;  %s29_s22 = sadd.s32 1, %s1971_s22   ;;  %s2629_s17 = sld [smem:[#allocation19_spill]] }
 0x52d   : > { %p2509_p2 = scmp.ge.s32.totalorder %s29_s22, 10   ;;  %s2630_s0 = sld [smem:[#allocation20_spill]] }
 0x52e   : > { %s2631_s19 = sld [smem:[#allocation23_spill]]  ;;  %s2632_s9 = sld [smem:[#allocation24_spill]] }
 0x52f   : > { %s2633_s25 = smov %s2653_s11  ;;  %s2635_s11 = smov %s1927_s12 }
 0x530   : > { %s2636_s12 = smov %s1931_s13  ;;  %s2637_s13 = smov %s2264_s27 }
 0x531   : > { %s2638_s14 = smov %s1939_s15  ;;  %s2639_s15 = smov %s1943_s16 }
 0x532   : > { %s2640_s16 = smov %s2259_s10  ;;  %s2641_s18 = smov %s1967_s21 }
 0x533   : > { %s2643_s21 = smov %s2633_s25  ;;  %28 = sbr.rel (!%p2509_p2) target bundleno = 18 (0x12), region = 122 }
 0x534   : > { %s2642_s20 = smov %s2632_s9 }
 0x53a   :  { %1243 = vsyncpa [#allocation8], 1 }
 0x53b   :  { %1245 = vsyncpa [#allocation8 + $0x1], 1 }
 0x53c   :  { %1246 = vsyncpa [#allocation11], 1 }
 0x53d   :  { %1248 = vsyncpa [#allocation11 + $0x1], 1 }
 0x53e   :  { %1249 = vsyncpa [#allocation9], 1 }
 0x53f   :  { %1251 = vsyncpa [#allocation9 + $0x1], 1 }

</bundles_post_ra>
